<compile_context>
chip_gen: v6e
topology: v6e:2x2x1
jax: 0.10.0
libtpu: 0.0.40
codegen_flags: <defaults>
</compile_context>

<pallas_src>
import math

import jax
import jax.numpy as jnp
from jax.experimental import pallas as pl
from jax.experimental.pallas import tpu as pltpu


def _tpu_caps():
    """Best-effort (per-core VMEM bytes, #TensorCores). Conservative defaults."""
    vmem_cap = None
    num_tc = None
    try:
        info = pltpu.get_tpu_info()
        vmem_cap = getattr(info, "vmem_capacity_bytes", None)
        for name in ("num_cores", "core_count", "num_tensorcores", "tensorcore_count"):
            val = getattr(info, name, None)
            if val:
                num_tc = int(val)
                break
    except Exception:
        pass
    kind = ""
    try:
        kind = jax.devices()[0].device_kind.lower()
    except Exception:
        pass
    if vmem_cap is None:
        big = any(t in kind for t in ("v2", "v3", "v4", "v5", "v6"))
        vmem_cap = (128 if big else 64) * 1024 * 1024        # unknown -> v7x-safe
    if num_tc is None:
        single = any(t in kind for t in ("v5e", "v5 lite", "v5lite",
                                         "v6e", "v6 lite", "v6lite"))
        num_tc = 1 if single else 2                          # unknown -> assume megacore
    return int(vmem_cap), int(num_tc)


def _seq_attn_kernel(q_ref, x_ref, o_ref):
    # q_ref: (1, D) in x's dtype, constant across the grid (stays resident)
    # x_ref: (tbg, g, S, D) native dtype
    # o_ref: (tbg, g*D)
    g = x_ref.shape[1]
    D = x_ref.shape[3]
    q = q_ref[...]                                              # (1, D)
    for j in range(g):                                          # g <= 4, static unroll
        xj = x_ref[:, j, :, :]                                  # (tbg, S, D) leading-dim slice
        # scores <q, x_s>: native-dtype VPU multiply + f32-accumulated lane reduce
        s = jnp.sum(xj * q, axis=-1, keepdims=True, dtype=jnp.float32)   # (tbg, S, 1)
        # numerically stable softmax over the key axis S
        m = jnp.max(s, axis=1, keepdims=True)                   # (tbg, 1, 1)
        e = jnp.exp(s - m)                                      # (tbg, S, 1) f32
        denom = jnp.sum(e, axis=1, keepdims=True)               # (tbg, 1, 1)
        # unnormalized weighted value sum (native-dtype multiply, f32 accumulate),
        # then ONE exact divide on the small (tbg, D) accumulator
        acc = jnp.sum(e.astype(xj.dtype) * xj, axis=1, dtype=jnp.float32)  # (tbg, D)
        oj = acc / denom[:, :, 0]                               # (tbg, D) / (tbg, 1)
        # lane slice [j*D:(j+1)*D] of the lane-dense output row
        o_ref[:, j * D:(j + 1) * D] = oj.astype(o_ref.dtype)


def sequence_attention(x, query, *, target_tile_bytes=None, vmem_limit_bytes=None):
    """x: [B, S, D] (values == keys), query: [D] learned query -> [B, D]."""
    B, S, D = x.shape
    assert query.shape == (D,)
    out_dtype = x.dtype

    vmem_cap, num_tc = _tpu_caps()

    # ---- generation-gated budgets -------------------------------------------
    if vmem_cap >= 100 * 1024 * 1024:          # v5e / v6e / v5p / v4: 128 MiB VMEM
        tile_target = 16 * 1024 * 1024
        vmem_limit = 96 * 1024 * 1024
    else:                                      # v7x: 64 MiB VMEM per TensorCore
        tile_target = 6 * 1024 * 1024
        vmem_limit = 44 * 1024 * 1024
    if target_tile_bytes is not None:
        tile_target = int(target_tile_bytes)

    # ---- lane-dense output fold: pack g batch rows per output row ------------
    g = math.gcd(B, 128 // D) if (D < 128 and 128 % D == 0) else 1
    rows = B // g                              # g divides B by construction
    xg = x.reshape(rows, g, S, D)              # contiguous view, no HBM copy

    # Lane/sublane-padded VMEM bytes of one grouped row (Mosaic pads the
    # trailing (S, D) tile to (sublane, 128) multiples).
    itemsize = x.dtype.itemsize
    sub = {4: 8, 2: 16, 1: 32}.get(itemsize, 8)
    row_vmem = g * (-(-S // sub) * sub) * (-(-D // 128) * 128) * itemsize

    # ---- rows per grid step ---------------------------------------------------
    n_buf = 3                                  # x buffer depth used for budgeting
    budget = int(0.7 * vmem_limit)
    tbg = min(rows,
              max(1, tile_target // row_vmem),
              max(1, budget // (n_buf * row_vmem)))

    # On multi-TensorCore parts leave >= ~4 grid steps per core so both cores
    # get work and still double-buffer; keep tiles >= ~1.5 MiB regardless.
    if num_tc > 1 and rows > 1:
        min_rows = max(1, (3 * 1024 * 1024 // 2) // row_vmem)
        tbg = min(tbg, max(1, min_rows, rows // (4 * num_tc)))

    # Output block's second-to-last dim must be a multiple of 8 (f32 sublane
    # tiling) unless it spans the whole `rows` axis.
    if tbg < rows:
        tbg = min(rows, max(8, tbg - tbg % 8))
    num_steps = pl.cdiv(rows, tbg)             # ragged tail masked by Pallas

    # TODO(synk): add an S-chunked (online-softmax) path for shapes where a
    # single (g, S, D) grouped row does not fit v7x's 64 MiB VMEM.
    est = n_buf * tbg * row_vmem + (4 << 20)
    vmem_limit = min(int(0.9 * vmem_cap), max(vmem_limit, est))
    if vmem_limit_bytes is not None:
        vmem_limit = int(vmem_limit_bytes)

    q2d = query.reshape(1, D).astype(x.dtype)  # native-dtype multiplies (bf16 VPU)

    x_spec_kwargs = {}
    if num_steps >= 3:
        x_spec_kwargs["pipeline_mode"] = pl.Buffered(3)   # smooth DMA jitter

    out = pl.pallas_call(
        _seq_attn_kernel,
        out_shape=jax.ShapeDtypeStruct((rows, g * D), out_dtype),
        grid_spec=pltpu.PrefetchScalarGridSpec(
            num_scalar_prefetch=0,
            grid=(num_steps,),
            in_specs=[
                # tiny constant block; constant index_map keeps it resident
                pl.BlockSpec((1, D), lambda b: (0, 0)),
                pl.BlockSpec((tbg, g, S, D), lambda b: (b, 0, 0, 0),
                             **x_spec_kwargs),
            ],
            out_specs=pl.BlockSpec((tbg, g * D), lambda b: (b, 0)),
        ),
        compiler_params=pltpu.CompilerParams(
            dimension_semantics=("parallel",),
            vmem_limit_bytes=int(vmem_limit),
        ),
    )(q2d, xg)

    return out.reshape(B, D)


def sequence_attention_ref(x, query):
    # pure-JAX reference of the PyTorch forward (dot scoring, 1 head, no dropout)
    xf = x.astype(jnp.float32)
    scores = jnp.einsum("d,bsd->bs", query.astype(jnp.float32), xf)
    w = jax.nn.softmax(scores, axis=-1)
    return jnp.einsum("bs,bsd->bd", w, xf).astype(x.dtype)


if __name__ == "__main__":
    key_dim = 32   # key_dim == query_dim == value_dim
    k0, k1, k2, k3 = jax.random.split(jax.random.PRNGKey(0), 4)
    # nn.init.normal_(self.query, mean=0, std=0.02)
    query_param = 0.02 * jax.random.normal(k0, (key_dim,), dtype=jnp.float32)

    # case 1: tiny batch (B=2): partial lane fold (g=2), single grid step
    x1 = jax.random.normal(k1, (2, 8, key_dim), dtype=jnp.float32)
    o1 = jax.block_until_ready(sequence_attention(x1, query_param))
    r1 = sequence_attention_ref(x1, query_param)
    assert o1.shape == (2, key_dim)
    assert jnp.allclose(o1, r1, atol=1e-5, rtol=1e-5), "mismatch (small batch)"

    # case 2: B=64 -> full 128-lane output fold (g=4)
    x2 = jax.random.normal(k2, (64, 8, key_dim), dtype=jnp.float32)
    o2 = jax.block_until_ready(sequence_attention(x2, query_param))
    r2 = sequence_attention_ref(x2, query_param)
    assert o2.shape == (64, key_dim)
    assert jnp.allclose(o2, r2, atol=1e-5, rtol=1e-5), "mismatch (lane-dense fold)"

    # case 3: ragged grid (no padding copy), multi-step pipeline, Buffered(3):
    # shrink the tile target so B=50 spans several blocks with a partial tail.
    x3 = jax.random.normal(k3, (50, 8, key_dim), dtype=jnp.float32)
    o3 = jax.block_until_ready(
        sequence_attention(x3, query_param, target_tile_bytes=32 * 1024))
    r3 = sequence_attention_ref(x3, query_param)
    assert o3.shape == (50, key_dim)
    assert jnp.allclose(o3, r3, atol=1e-5, rtol=1e-5), "mismatch (ragged tail)"

    print("KERNEL_OK")
</pallas_src>

<mosaic_0001>
module attributes {stable_mosaic.version = 11 : i64} {
  func.func @_seq_attn_kernel(%arg0: i32, %arg1: memref<1x32xf32, #tpu.memory_space<vmem>>, %arg2: memref<1x2x8x32xf32, #tpu.memory_space<vmem>>, %arg3: memref<1x64xf32, #tpu.memory_space<vmem>>) attributes {dimension_semantics = [#tpu.dimension_semantics<parallel>], iteration_bounds = array<i64: 1>, scalar_prefetch = 0 : i64, scratch_operands = 0 : i64, tpu.core_type = #tpu.core_type<tc>, window_params = [{pipeline_mode = #tpu.pipeline_mode<synchronous>, transform_indices = @transform_0, window_bounds = array<i64: 1, 32>}, {transform_indices = @transform_1, window_bounds = array<i64: 1, 2, 8, 32>}, {transform_indices = @transform_2, window_bounds = array<i64: 1, 64>}]} {
    %c0 = arith.constant 0 : index
    %c0_0 = arith.constant 0 : index
    %0 = vector.load %arg1[%c0, %c0_0] : memref<1x32xf32, #tpu.memory_space<vmem>>, vector<1x32xf32>
    %c0_1 = arith.constant 0 : index
    %c0_2 = arith.constant 0 : index
    %c0_3 = arith.constant 0 : index
    %c0_4 = arith.constant 0 : index
    %1 = vector.load %arg2[%c0_1, %c0_2, %c0_3, %c0_4] : memref<1x2x8x32xf32, #tpu.memory_space<vmem>>, vector<1x1x8x32xf32>
    %2 = vector.shape_cast %1 : vector<1x1x8x32xf32> to vector<1x8x32xf32>
    %3 = vector.shape_cast %0 : vector<1x32xf32> to vector<1x1x32xf32>
    %4 = vector.broadcast %3 : vector<1x1x32xf32> to vector<1x8x32xf32>
    %5 = arith.mulf %2, %4 : vector<1x8x32xf32>
    %cst = arith.constant dense<0.000000e+00> : vector<1x8xf32>
    %6 = vector.multi_reduction <add>, %5, %cst [2] : vector<1x8x32xf32> to vector<1x8xf32>
    %7 = vector.shape_cast %6 : vector<1x8xf32> to vector<1x8x1xf32>
    %cst_5 = arith.constant dense<0xFF800000> : vector<1x1xf32>
    %8 = vector.multi_reduction <maximumf>, %7, %cst_5 [1] : vector<1x8x1xf32> to vector<1x1xf32>
    %9 = vector.shape_cast %8 : vector<1x1xf32> to vector<1x1x1xf32>
    %10 = vector.broadcast %9 : vector<1x1x1xf32> to vector<1x8x1xf32>
    %11 = arith.subf %7, %10 : vector<1x8x1xf32>
    %12 = math.exp %11 : vector<1x8x1xf32>
    %cst_6 = arith.constant dense<0.000000e+00> : vector<1x1xf32>
    %13 = vector.multi_reduction <add>, %12, %cst_6 [1] : vector<1x8x1xf32> to vector<1x1xf32>
    %14 = vector.shape_cast %13 : vector<1x1xf32> to vector<1x1x1xf32>
    %15 = vector.broadcast %12 : vector<1x8x1xf32> to vector<1x8x32xf32>
    %16 = arith.mulf %15, %2 : vector<1x8x32xf32>
    %cst_7 = arith.constant dense<0.000000e+00> : vector<1x32xf32>
    %17 = vector.multi_reduction <add>, %16, %cst_7 [1] : vector<1x8x32xf32> to vector<1x32xf32>
    %18 = vector.shape_cast %14 : vector<1x1x1xf32> to vector<1x1xf32>
    %19 = vector.broadcast %18 : vector<1x1xf32> to vector<1x32xf32>
    %20 = arith.divf %17, %19 : vector<1x32xf32>
    %c0_8 = arith.constant 0 : index
    %c0_9 = arith.constant 0 : index
    %21 = vector.load %arg3[%c0_8, %c0_9] : memref<1x64xf32, #tpu.memory_space<vmem>>, vector<1x32xf32>
    tpu.vector_store %arg3[%c0_8, %c0_9], %20 {strides = array<i32>} : memref<1x64xf32, #tpu.memory_space<vmem>>, vector<1x32xf32>,
    %c0_10 = arith.constant 0 : index
    %c1 = arith.constant 1 : index
    %c0_11 = arith.constant 0 : index
    %c0_12 = arith.constant 0 : index
    %22 = vector.load %arg2[%c0_10, %c1, %c0_11, %c0_12] : memref<1x2x8x32xf32, #tpu.memory_space<vmem>>, vector<1x1x8x32xf32>
    %23 = vector.shape_cast %22 : vector<1x1x8x32xf32> to vector<1x8x32xf32>
    %24 = vector.shape_cast %0 : vector<1x32xf32> to vector<1x1x32xf32>
    %25 = vector.broadcast %24 : vector<1x1x32xf32> to vector<1x8x32xf32>
    %26 = arith.mulf %23, %25 : vector<1x8x32xf32>
    %cst_13 = arith.constant dense<0.000000e+00> : vector<1x8xf32>
    %27 = vector.multi_reduction <add>, %26, %cst_13 [2] : vector<1x8x32xf32> to vector<1x8xf32>
    %28 = vector.shape_cast %27 : vector<1x8xf32> to vector<1x8x1xf32>
    %cst_14 = arith.constant dense<0xFF800000> : vector<1x1xf32>
    %29 = vector.multi_reduction <maximumf>, %28, %cst_14 [1] : vector<1x8x1xf32> to vector<1x1xf32>
    %30 = vector.shape_cast %29 : vector<1x1xf32> to vector<1x1x1xf32>
    %31 = vector.broadcast %30 : vector<1x1x1xf32> to vector<1x8x1xf32>
    %32 = arith.subf %28, %31 : vector<1x8x1xf32>
    %33 = math.exp %32 : vector<1x8x1xf32>
    %cst_15 = arith.constant dense<0.000000e+00> : vector<1x1xf32>
    %34 = vector.multi_reduction <add>, %33, %cst_15 [1] : vector<1x8x1xf32> to vector<1x1xf32>
    %35 = vector.shape_cast %34 : vector<1x1xf32> to vector<1x1x1xf32>
    %36 = vector.broadcast %33 : vector<1x8x1xf32> to vector<1x8x32xf32>
    %37 = arith.mulf %36, %23 : vector<1x8x32xf32>
    %cst_16 = arith.constant dense<0.000000e+00> : vector<1x32xf32>
    %38 = vector.multi_reduction <add>, %37, %cst_16 [1] : vector<1x8x32xf32> to vector<1x32xf32>
    %39 = vector.shape_cast %35 : vector<1x1x1xf32> to vector<1x1xf32>
    %40 = vector.broadcast %39 : vector<1x1xf32> to vector<1x32xf32>
    %41 = arith.divf %38, %40 : vector<1x32xf32>
    %c0_17 = arith.constant 0 : index
    %c32 = arith.constant 32 : index
    %42 = vector.load %arg3[%c0_17, %c32] : memref<1x64xf32, #tpu.memory_space<vmem>>, vector<1x32xf32>
    tpu.vector_store %arg3[%c0_17, %c32], %41 {strides = array<i32>} : memref<1x64xf32, #tpu.memory_space<vmem>>, vector<1x32xf32>,
    return
  }
  func.func @transform_0(%arg0: i32) -> (i32, i32) {
    %c0_i32 = arith.constant 0 : i32
    %c0_i32_0 = arith.constant 0 : i32
    %c0_i32_1 = arith.constant 0 : i32
    return %c0_i32, %c0_i32_0 : i32, i32
  }
  func.func @transform_1(%arg0: i32) -> (i32, i32, i32, i32) {
    %c0_i32 = arith.constant 0 : i32
    %c0_i32_0 = arith.constant 0 : i32
    %c0_i32_1 = arith.constant 0 : i32
    %c0_i32_2 = arith.constant 0 : i32
    return %arg0, %c0_i32, %c0_i32_0, %c0_i32_1 : i32, i32, i32, i32
  }
  func.func @transform_2(%arg0: i32) -> (i32, i32) {
    %c0_i32 = arith.constant 0 : i32
    %c0_i32_0 = arith.constant 0 : i32
    return %arg0, %c0_i32 : i32, i32
  }
}

</mosaic_0001>

<bundles_post_ra>
// kernel: tpu_custom_call.1
= control target key start
LH: loop header
LB: loop body
LE: loop exit
PB: predicated region body
PF: predicated region fallthrough
CT: control target
= control target key end

     0   :  { %7 = vsyncpa [#allocation3], 0  ;;  %s246_s0 = inlined_call_operand.hbm [shape: f32[1,32], index: 0, kind: input, shape index: {}]   ;;  %s247_s1 = inlined_call_operand.hbm [shape: f32[1,2,8,32], index: 1, kind: input, shape index: {}]   ;;  %s248_s2 = inlined_call_operand.hbm [shape: f32[1,64], index: 2, kind: output, shape index: {}]  }
   0x1   :  { %8 = vsyncpa [#allocation6], 0 }
   0x2   :  { %9 = vsyncpa [#allocation4], 0  ;;  %s212_s9 = smov [#allocation2]   ;;  %s213_s11 = smov [#allocation5]  }
   0x3   :  { %s16_s10 = sshll.u32 %s212_s9, 4  ;;  %s25_s12 = sshll.u32 %s213_s11, 4  ;;  %s17_s10 = int_to_ptr.vmem [resolvable:$true] %s16_s10  ;;  %s26_s12 = int_to_ptr.vmem [resolvable:$true] %s25_s12 }
   0x4   :  { %s154_s13 = scalar_lea.vmem %s17_s10, 16  ;;  %s158_s14 = scalar_lea.vmem %s17_s10, 32 }
   0x5   :  { %p155_p0 = scmp.ne.s32.totalorder %s17_s10, %s154_s13  ;;  %p159_p1 = scmp.lt.s32.totalorder %s17_s10, %s17_s10 }
   0x6   :  { %p160_p2 = scmp.lt.s32.totalorder %s158_s14, %s154_s13 }
   0x8   :  { %p161_p3 = por %p160_p2, %p159_p1 }
   0xa   :  { %p162_p4 = pnand %p161_p3, %p155_p0 }
   0xc   :  { %165 = shalt.err (!%p162_p4)
}
   0xd   :  { %19 = dma.hbm_to_vmem [thread:$0]  %s246_s0, 16, %s17_s10, [#allocation3]  }
   0xe   :  { %s174_s17 = scalar_lea.vmem %s26_s12, 256  ;;  %p179_p6 = scmp.lt.s32.totalorder %s26_s12, %s26_s12 }
   0xf   :  { %p175_p5 = scmp.ne.s32.totalorder %s26_s12, %s174_s17  ;;  %p180_p7 = scmp.lt.s32.totalorder %s174_s17, %s174_s17 }
  0x11   :  { %p181_p8 = por %p180_p7, %p179_p6 }
  0x13   :  { %p182_p9 = pnand %p181_p8, %p175_p5 }
  0x15   :  { %185 = shalt.err (!%p182_p9)
}
  0x16   :  { %s214_s18 = smov 128   ;;  %s215_s19 = smov 8  }
  0x17   :  { %31 = dma.hbm_to_vmem [thread:$0]  %s247_s1, 256, %s26_s12, [#allocation6], %s214_s18, %s214_s18, %s215_s19  }
  0x18   :  { %206 = dma.done.wait [#allocation3], 16  }
  0x19   :  { %207 = vsyncadd [#allocation3], 4294967280 }
  0x1a   :  { %208 = dma.done.wait [#allocation6], 256  }
  0x1b   :  { %209 = vsyncadd [#allocation6], 4294967040  ;;  %v131_v0 = vld [vmem:[#allocation2] ss:$0 sm:$0xff]  ;;  %vm47_vm0 = vcmask 261120   ;;  %v79_v1 = vld [vmem:[#allocation5 + $0x8] sm:$0xff] }
  0x1c   :  { %v39_v2 = vld [vmem:[#allocation5] sm:$0xff]  ;;  %v80_v3 = vmul.f32 %v131_v0, %v79_v1  ;;  %s216_s0 = smov 32   ;;  %vm76_vm1 = vcmask 253952   ;;  %s217_s1 = smov [#allocation7]   ;;  %vm113_vm2 = vcmask 516352  }
  0x1d   :  { %v46_v4 = vmul.f32 %v131_v0, %v39_v2  ;;  %s121_s22 = sshll.u32 %s217_s1, 4  ;;  %s122_s22 = int_to_ptr.vmem [resolvable:$true] %s121_s22 }
  0x1e   :  { %v81_v5 = vsel %vm47_vm0, %v80_v3, 0.0  ;;  %s186_s23 = scalar_lea.vmem %s122_s22, 16  ;;  %s190_s24 = scalar_lea.vmem %s122_s22, 32 }
  0x1f   :  { %82 = vadd.xlane.f32.xlu0 %v81_v5  ;;  %v48_v6 = vsel %vm47_vm0, %v46_v4, 0.0  ;;  %p187_p10 = scmp.ne.s32.totalorder %s122_s22, %s186_s23  ;;  %p191_p11 = scmp.lt.s32.totalorder %s122_s22, %s122_s22 }
  0x20   :  { %p192_p12 = scmp.lt.s32.totalorder %s190_s24, %s186_s23 }
  0x22   :  { %p193_p13 = por %p192_p12, %p191_p11 }
  0x23   :  { %49 = vadd.xlane.f32.xlu0 %v48_v6 }
  0x24   :  { %p194_p0 = pnand %p193_p13, %p187_p10 }
  0xa8   :  { %v83_v7 = vpop.xlane.xlu0 %82 }
  0xa9   :  { %v84_v8 = vrot.slane %v83_v7, 4 }
  0xab   :  { %v85_v9 = vmax.f32 %v83_v7, %v84_v8 }
  0xac   :  { %v50_v10 = vpop.xlane.xlu0 %49 }
  0xad   :  { %v86_v11 = vrot.slane %v85_v9, 2  ;;  %v51_v12 = vrot.slane %v50_v10, 4 }
  0xaf   :  { %v87_v13 = vmax.f32 %v85_v9, %v86_v11  ;;  %v52_v14 = vmax.f32 %v50_v10, %v51_v12 }
  0xb1   :  { %v88_v15 = vrot.slane %v87_v13, 1  ;;  %v53_v16 = vrot.slane %v52_v14, 2 }
  0xb3   :  { %v89_v17 = vmax.f32 %v87_v13, %v88_v15  ;;  %v54_v18 = vmax.f32 %v52_v14, %v53_v16 }
  0xb5   :  { %v90_v19 = vsub.f32 %v83_v7, %v89_v17  ;;  %v55_v20 = vrot.slane %v54_v18, 1 }
  0xb7   :  { %v91_v21 = vmul.f32 1.442695, %v90_v19  ;;  %v56_v22 = vmax.f32 %v54_v18, %v55_v20 }
  0xb9   :  { %138 = vpow2.f32 %v91_v21  ;;  %v57_v23 = vsub.f32 %v50_v10, %v56_v22 }
  0xbb   :  { %v58_v24 = vmul.f32 1.442695, %v57_v23 }
  0xbd   :  { %140 = vpow2.f32 %v58_v24 }
  0xc6   :  { %v139_v25 = vpop.eup %138 }
  0xc7   :  { %v93_v26 = vrot.slane %v139_v25, 4  ;;  %v99_v27 = vmul.f32 %v139_v25, %v79_v1 }
  0xc9   :  { %v94_v28 = vadd.f32 %v139_v25, %v93_v26  ;;  %v100_v29 = vsel %vm47_vm0, %v99_v27, 0.0 }
  0xca   :  { %v141_v30 = vpop.eup %140  ;;  %v101_v32 = vrot.slane %v100_v29, 4 }
  0xcb   :  { %v95_v31 = vrot.slane %v94_v28, 2  ;;  %v60_v33 = vrot.slane %v141_v30, 4  ;;  %v66_v34 = vmul.f32 %v141_v30, %v39_v2 }
  0xcc   :  { %v102_v40 = vadd.f32 %v101_v32, %v100_v29 }
  0xcd   :  { %v96_v35 = vadd.f32 %v95_v31, %v94_v28  ;;  %v61_v36 = vadd.f32 %v141_v30, %v60_v33  ;;  %v67_v37 = vsel %vm47_vm0, %v66_v34, 0.0 }
  0xce   :  { %v68_v38 = vrot.slane %v67_v37, 4  ;;  %v103_v45 = vrot.slane %v102_v40, 2 }
  0xcf   :  { %v97_v39 = vrot.slane %v96_v35, 1  ;;  %v62_v41 = vrot.slane %v61_v36, 2 }
  0xd0   :  { %v69_v44 = vadd.f32 %v68_v38, %v67_v37  ;;  %v104_v49 = vadd.f32 %v103_v45, %v102_v40 }
  0xd1   :  { %v98_v42 = vadd.f32 %v97_v39, %v96_v35  ;;  %v63_v43 = vadd.f32 %v62_v41, %v61_v36 }
  0xd2   :  { %v70_v48 = vrot.slane %v69_v44, 2  ;;  %v105_v51 = vrot.slane %v104_v49, 1 }
  0xd3   :  { %142 = vrcp.f32 %v98_v42  ;;  %v64_v46 = vrot.slane %v63_v43, 1 }
  0xd4   :  { %v71_v50 = vadd.f32 %v70_v48, %v69_v44  ;;  %v106_v53 = vadd.f32 %v105_v51, %v104_v49 }
  0xd5   :  { %v65_v47 = vadd.f32 %v64_v46, %v63_v43 }
  0xd6   :  { %v72_v52 = vrot.slane %v71_v50, 1 }
  0xd7   :  { %144 = vrcp.f32 %v65_v47 }
  0xd8   :  { %v73_v56 = vadd.f32 %v72_v52, %v71_v50 }
  0xe0   :  { %v143_v54 = vpop.eup %142 }
  0xe1   :  { %v108_v55 = vmul.f32 %v143_v54, %v106_v53 }
  0xe3   :  { %110 = vrot.lane.b32.xlu1 %v108_v55, %s216_s0 }
  0xe4   :  { %v145_v57 = vpop.eup %144 }
  0xe5   :  { %v75_v58 = vmul.f32 %v145_v57, %v73_v56 }
  0xe7   :  { %77 = vst.msk [vmem:[#allocation7] sm:$0x1] %vm76_vm1, %v75_v58 }
 0x155   :  { %v111_v59 = vpop.permute.xlu1 %110 }
 0x156   :  { %114 = vst.msk [vmem:[#allocation7] sm:$0x1] %vm113_vm2, %v111_v59 }
 0x157   :  { %197 = shalt.err (!%p194_p0)
}
 0x158   :  { %124 = dma.vmem_to_hbm [thread:$0]  %s122_s22, 16, %s248_s2, [#allocation4]  }
 0x159   :  { %210 = dma.done.wait [#allocation4], 16  }
 0x15a   :  { %211 = vsyncadd [#allocation4], 4294967280 }
 0x15b   :  { %128 = vsyncpa [#allocation3], 1 }
 0x15c   :  { %129 = vsyncpa [#allocation6], 1 }
 0x15d   :  { %130 = vsyncpa [#allocation4], 1 }

</bundles_post_ra>
